<compile_context>
chip_gen: v6e
topology: v6e:2x2x1
jax: 0.10.0
libtpu: 0.0.40
codegen_flags: <defaults>
</compile_context>

<pallas_src>
import functools

import jax
import jax.numpy as jnp
from jax import lax
from jax.experimental import pallas as pl
from jax.experimental.pallas import tpu as pltpu


def _bi_kernel_grouped(x_ref, o_ref, *, embed_dim, n_groups, chunk, n_chunks):
    """Fast path.  x_ref: (tb, F*D) with F*D % 128 == 0 and 128 % D == 0."""
    D = embed_dim

    def per_chunk(c, carry):
        r0 = c * chunk
        if not isinstance(c, int):
            r0 = pl.multiple_of(r0, chunk)
        rows = pl.ds(r0, chunk)
        # Accumulate sum / sum-of-squares over aligned 128-lane groups.
        # Each slice is read from the ref and upcast to f32 as it is consumed
        # (no whole-tile f32 temporary).  Pure VPU adds, no cross-lane work.
        xg = x_ref[rows, 0:128].astype(jnp.float32)
        s = xg
        q = xg * xg
        for g in range(1, n_groups):                       # static, unrolled
            xg = x_ref[rows, g * 128:(g + 1) * 128].astype(jnp.float32)
            s = s + xg
            q = q + xg * xg
        # Butterfly-reduce the 128/D field slots inside the lane dim (XLU rolls).
        shift = 64
        while shift >= D:                                  # log2(128/D) steps
            s = s + pltpu.roll(s, shift, axis=1)
            q = q + pltpu.roll(q, shift, axis=1)
            shift //= 2
        res = (s * s - q) * 0.5
        o_ref[rows, :] = res[:, 0:D].astype(o_ref.dtype)
        return carry

    if n_chunks <= 4:
        for c in range(n_chunks):
            per_chunk(c, None)
    else:
        lax.fori_loop(0, n_chunks, per_chunk, None)


def _bi_kernel_generic(x_ref, o_ref, *, chunk, n_chunks):
    """Fallback for arbitrary D.  x_ref: (tb, F, D)."""

    def per_chunk(c, carry):
        r0 = c * chunk
        if not isinstance(c, int):
            r0 = pl.multiple_of(r0, chunk)
        rows = pl.ds(r0, chunk)
        x = x_ref[rows, :, :].astype(jnp.float32)          # (chunk, F, D)
        s = jnp.sum(x, axis=1)
        q = jnp.sum(x * x, axis=1)
        o_ref[rows, :] = ((s * s - q) * 0.5).astype(o_ref.dtype)
        return carry

    if n_chunks <= 4:
        for c in range(n_chunks):
            per_chunk(c, None)
    else:
        lax.fori_loop(0, n_chunks, per_chunk, None)


def bi_interaction_layer(feat_emb_value: jax.Array, *, block_batch=None) -> jax.Array:
    """NFM bi-interaction pooling: (B, F, D) -> (B, D), already divided by 2."""
    B, F, D = feat_emb_value.shape
    dtype = feat_emb_value.dtype
    itemsize = jnp.dtype(dtype).itemsize
    # Sublane packing for the batch-tile dim (f32: 8, bf16: 16, int8/fp8: 32).
    pack = {4: 8, 2: 16, 1: 32}.get(itemsize, 8)
    FD = F * D
    fast = (FD % 128 == 0) and (128 % D == 0)

    # --- batch tile: target ~8 MiB of input per grid step, but keep >= 2 grid
    # steps so both v7x TensorCores get work ("parallel" batch axis).
    row_bytes = FD * itemsize
    if block_batch is not None:
        tb = int(block_batch)
    else:
        tb = max(1, (8 << 20) // max(row_bytes, 1))
        if tb >= B:
            tb = pl.cdiv(B, 2)
    tb = max(1, min(tb, B))
    if tb < B:
        if tb >= 64:
            tb = (tb // 64) * 64          # multiple of 64: legal for all dtypes
        else:
            tb = max(pack, (tb // pack) * pack)
        tb = min(tb, B)

    # --- in-kernel row chunk: keeps the f32 sum / sum-of-squares accumulators
    # vreg-resident instead of spilling (tb, D)-sized temporaries to VMEM.
    chunk = tb
    for c in (64, 32, 16, 8):
        if tb % c == 0:
            chunk = c
            break
    n_chunks = tb // chunk

    grid = (pl.cdiv(B, tb),)

    # --- VMEM budget: 2x double-buffered (padded) in/out blocks + headroom,
    # capped at 48 MiB (v7x has 64 MiB physical per TensorCore).
    tb_pad = pl.cdiv(tb, pack) * pack
    fd_pad = pl.cdiv(FD, 128) * 128
    d_pad = pl.cdiv(D, 128) * 128
    buf_bytes = 2 * tb_pad * fd_pad * itemsize + 2 * tb_pad * d_pad * itemsize
    vmem_limit = int(min(48 << 20, max(16 << 20, buf_bytes + (8 << 20))))

    cost = pl.CostEstimate(
        flops=4 * B * F * D,              # s += x, q += x*x, epilogue
        transcendentals=0,
        bytes_accessed=B * FD * itemsize + B * D * itemsize,
    )

    if fast:
        operand = feat_emb_value.reshape(B, FD)   # free row-major, lane-dense
        kernel = functools.partial(
            _bi_kernel_grouped, embed_dim=D, n_groups=FD // 128,
            chunk=chunk, n_chunks=n_chunks)
        in_specs = [pl.BlockSpec((tb, FD), lambda i: (i, 0))]
    else:
        operand = feat_emb_value
        kernel = functools.partial(_bi_kernel_generic, chunk=chunk, n_chunks=n_chunks)
        in_specs = [pl.BlockSpec((tb, F, D), lambda i: (i, 0, 0))]

    return pl.pallas_call(
        kernel,
        out_shape=jax.ShapeDtypeStruct((B, D), dtype),
        grid=grid,
        in_specs=in_specs,
        out_specs=pl.BlockSpec((tb, D), lambda i: (i, 0)),
        compiler_params=pltpu.CompilerParams(
            dimension_semantics=("parallel",),    # v7x: shard batch tiles over both TCs
            vmem_limit_bytes=vmem_limit,
        ),
        cost_estimate=cost,
    )(operand)


def _reference(feat_emb_value: jax.Array) -> jax.Array:
    x = feat_emb_value.astype(jnp.float32)
    bi = jnp.sum(x, axis=1) ** 2 - jnp.sum(x * x, axis=1)
    return (bi / 2).astype(feat_emb_value.dtype)


if __name__ == "__main__":
    key = jax.random.PRNGKey(0)
    B, F, D = 64, 8, 32  # batch, num_fields, embed_dim (small test shapes)
    x = jax.random.normal(key, (B, F, D), dtype=jnp.float32)

    # Multi-step grid (4 tiles of 16 rows) so the pipelined fast path is exercised.
    out = bi_interaction_layer(x, block_batch=16)
    jax.block_until_ready(out)
    ref = _reference(x)
    assert out.shape == (B, D), out.shape
    assert jnp.allclose(out, ref, atol=1e-5, rtol=1e-5), "mismatch vs reference (f32)"

    # Default (auto) tiling path, including the >=2-grid-steps logic.
    out2 = bi_interaction_layer(x)
    jax.block_until_ready(out2)
    assert jnp.allclose(out2, ref, atol=1e-5, rtol=1e-5), "mismatch vs reference (auto tile)"

    # bf16 input with a non-divisible batch (padded edge block).
    xb = jax.random.normal(jax.random.PRNGKey(1), (50, 8, 32), dtype=jnp.bfloat16)
    outb = bi_interaction_layer(xb)
    jax.block_until_ready(outb)
    refb = _reference(xb)
    assert jnp.allclose(outb.astype(jnp.float32), refb.astype(jnp.float32),
                        atol=1e-1, rtol=5e-2), "mismatch vs reference (bf16, edge block)"

    # Generic-D fallback path (128 % D != 0).
    xg = jax.random.normal(jax.random.PRNGKey(2), (32, 5, 48), dtype=jnp.float32)
    outg = bi_interaction_layer(xg)
    jax.block_until_ready(outg)
    refg = _reference(xg)
    assert jnp.allclose(outg, refg, atol=1e-4, rtol=1e-4), "mismatch vs reference (generic D)"

    print("KERNEL_OK")
</pallas_src>

<mosaic_0001>
module attributes {stable_mosaic.version = 11 : i64} {
  func.func @_bi_kernel_grouped(%arg0: i32, %arg1: memref<16x256xf32, #tpu.memory_space<vmem>>, %arg2: memref<16x32xf32, #tpu.memory_space<vmem>>) attributes {dimension_semantics = [#tpu.dimension_semantics<parallel>], iteration_bounds = array<i64: 4>, scalar_prefetch = 0 : i64, scratch_operands = 0 : i64, tpu.core_type = #tpu.core_type<tc>, window_params = [{transform_indices = @transform_0, window_bounds = array<i64: 16, 256>}, {transform_indices = @transform_1, window_bounds = array<i64: 16, 32>}]} {
    %c0 = arith.constant 0 : index
    %c0_0 = arith.constant 0 : index
    %0 = vector.load %arg1[%c0, %c0_0] : memref<16x256xf32, #tpu.memory_space<vmem>>, vector<16x128xf32>
    %1 = arith.mulf %0, %0 : vector<16x128xf32>
    %c0_1 = arith.constant 0 : index
    %c128 = arith.constant 128 : index
    %2 = vector.load %arg1[%c0_1, %c128] : memref<16x256xf32, #tpu.memory_space<vmem>>, vector<16x128xf32>
    %3 = arith.addf %0, %2 : vector<16x128xf32>
    %4 = arith.mulf %2, %2 : vector<16x128xf32>
    %5 = arith.addf %1, %4 : vector<16x128xf32>
    %c64_i32 = arith.constant 64 : i32
    %6 = tpu.dynamic_rotate %3 by %c64_i32 dim 1 : vector<16x128xf32>, i32 -> vector<16x128xf32>
    %7 = arith.addf %3, %6 : vector<16x128xf32>
    %c64_i32_2 = arith.constant 64 : i32
    %8 = tpu.dynamic_rotate %5 by %c64_i32_2 dim 1 : vector<16x128xf32>, i32 -> vector<16x128xf32>
    %9 = arith.addf %5, %8 : vector<16x128xf32>
    %c32_i32 = arith.constant 32 : i32
    %10 = tpu.dynamic_rotate %7 by %c32_i32 dim 1 : vector<16x128xf32>, i32 -> vector<16x128xf32>
    %11 = arith.addf %7, %10 : vector<16x128xf32>
    %c32_i32_3 = arith.constant 32 : i32
    %12 = tpu.dynamic_rotate %9 by %c32_i32_3 dim 1 : vector<16x128xf32>, i32 -> vector<16x128xf32>
    %13 = arith.addf %9, %12 : vector<16x128xf32>
    %14 = arith.mulf %11, %11 : vector<16x128xf32>
    %15 = arith.subf %14, %13 : vector<16x128xf32>
    %cst = arith.constant 5.000000e-01 : f32
    %16 = vector.broadcast %cst : f32 to vector<16x128xf32>
    %17 = arith.mulf %15, %16 : vector<16x128xf32>
    %18 = vector.extract_strided_slice %17 {offsets = [0, 0], sizes = [16, 32], strides = [1, 1]} : vector<16x128xf32> to vector<16x32xf32>
    %c0_4 = arith.constant 0 : index
    %c0_5 = arith.constant 0 : index
    %19 = vector.load %arg2[%c0_4, %c0_5] : memref<16x32xf32, #tpu.memory_space<vmem>>, vector<16x32xf32>
    tpu.vector_store %arg2[%c0_4, %c0_5], %18 {strides = array<i32>} : memref<16x32xf32, #tpu.memory_space<vmem>>, vector<16x32xf32>,
    return
  }
  func.func @transform_0(%arg0: i32) -> (i32, i32) {
    %c0_i32 = arith.constant 0 : i32
    %c0_i32_0 = arith.constant 0 : i32
    return %arg0, %c0_i32 : i32, i32
  }
  func.func @transform_1(%arg0: i32) -> (i32, i32) {
    %c0_i32 = arith.constant 0 : i32
    %c0_i32_0 = arith.constant 0 : i32
    return %arg0, %c0_i32 : i32, i32
  }
}

</mosaic_0001>

<bundles_post_ra>
// kernel: tpu_custom_call.1
= control target key start
LH: loop header
LB: loop body
LE: loop exit
PB: predicated region body
PF: predicated region fallthrough
CT: control target
= control target key end

     0   :  { %6 = vsyncpa [#allocation3], 0  ;;  %s490_s0 = inlined_call_operand.hbm [shape: f32[64,256], index: 0, kind: input, shape index: {}]   ;;  %s491_s1 = inlined_call_operand.vmem [shape: f32[64,32], index: 1, kind: output, shape index: {}]  }
   0x1   :  { %8 = vsyncpa [#allocation3 + $0x1], 0  ;;  %s390_s6 = smov 0   ;;  %s392_s7 = smov 0  }
   0x2   :  { %s394_s8 = smov 0   ;;  %s396_s9 = smov 0  }
   0x3 LB: > { %s252_s10 = sadd.s32 4294967295, %s373_s9   ;;  %s410_s11 = sadd.s32 1, %s373_s9   ;;  %s373_s9 = sphi %s396_s9, %s500_s9   ;;  %s369_s8 = sphi %s394_s8, %s499_s8   ;;  %s365_s7 = sphi %s392_s7, %s498_s7   ;;  %s361_s6 = sphi %s390_s6, %s497_s6  }
   0x4   : > { %s18_s12 = ssub.s32 %s373_s9, %s410_s11  ;;  %s21_s13 = sadd.s32 1, %s369_s8 }
   0x5   : > { %p19_p0 = scmp.eq.s32.totalorder %s18_s12, 0  ;;  %p28_p1 = scmp.ne.s32.totalorder %s369_s8, %s365_s7 }
   0x6   : > { %p29_p2 = scmp.eq.s32.totalorder %s373_s9, 0  ;;  %p34_p3 = scmp.ne.s32.totalorder %s365_s7, %s361_s6 }
   0x7   : > { %s420_s14 = scalar_select %p19_p0, %s369_s8, %s21_s13  }
   0x8   : > { %p30_p4 = por %p29_p2, %p28_p1  ;;  %p35_p5 = scmp.eq.s32.totalorder %s252_s10, 0 }
   0x9   : > { %p274_p6 = scmp.lt.s32.totalorder %s373_s9, 4  ;;  %s84_s16 = sand.u32 1, %s369_s8  }
   0xa   : > { %p425_p7 = por %p35_p5, %p34_p3  ;;  %s256_s17 = sshll.u32 %s84_s16, 5 }
   0xb   : > { %s267_s18 = sshll.u32 %s373_s9, 9  ;;  %s88_s22 = scalar_lea.vmem [#allocation2], %s256_s17 }
   0xc   : > { %s493_s15 = scalar_select %p425_p7, 1, 0 }
   0xd   : > { %s434_s21 = scalar_lea.hbm %s490_s0, %s267_s18  ;;  %s96_s23 = sshll.u32 %s88_s22, 4  ;;  %s436_s23 = int_to_ptr.vmem [resolvable:$true] %s96_s23 }
   0xe   : > { %p438_p8 = pnand %p274_p6, %p30_p4  ;;  %s443_s25 = scalar_lea.sflag [#allocation3], %s84_s16 }
   0xf   : > { %s311_s26 = scalar_lea.hbm %s434_s21, 512  ;;  %s316_s29 = scalar_lea.hbm %s490_s0, 2048 }
  0x10   : > { %p312_p10 = scmp.ne.s32.totalorder %s434_s21, %s311_s26  ;;  %p313_p11 = pneg %p438_p8 }
  0x11   : > { %p317_p0 = scmp.lt.s32.totalorder %s434_s21, %s490_s0  ;;  %p318_p1 = scmp.lt.s32.totalorder %s316_s29, %s311_s26 }
  0x12   : > { %p314_p12 = pnand %p313_p11, %p312_p10 }
  0x13   : > { %p319_p2 = por %p318_p1, %p317_p0 }
  0x14   : > { %p315_p13 = pneg %p314_p12 }
  0x16   : > { %p320_p3 = pnand %p319_p2, %p315_p13 }
  0x18   : > { %323 = shalt.err (!%p320_p3)
}
  0x19   : > { %s324_s3 = scalar_lea.vmem %s436_s23, 512  ;;  %s375_s4 = smov [#allocation2]  }
  0x1a   : > { %p325_p4 = scmp.ne.s32.totalorder %s436_s23, %s324_s3  ;;  %s329_s5 = sshll.u32 %s375_s4, 4  ;;  %s330_s5 = int_to_ptr.vmem [resolvable:$false] %s329_s5 }
  0x1b   : > { %s331_s6 = scalar_lea.vmem %s330_s5, 1024  ;;  %p332_p10 = scmp.lt.s32.totalorder %s436_s23, %s330_s5 }
  0x1c   : > { %p327_p5 = pnand %p325_p4, %p313_p11  ;;  %p333_p12 = scmp.lt.s32.totalorder %s331_s6, %s324_s3 }
  0x1e   : > { %p328_p6 = pneg %p327_p5  ;;  %p334_p9 = por %p333_p12, %p332_p10 }
  0x20   : > { %p335_p7 = pnand %p334_p9, %p328_p6 }
  0x22   : > { %338 = shalt.err (!%p335_p7)
}
  0x23   : > { %s376_s12 = smov 256   ;;  %s377_s13 = smov 16  }
  0x24   : > { %273 = dma.hbm_to_vmem [thread:$0]  (!%p438_p8), %s434_s21, 512, %s436_s23, %s443_s25, %s376_s12, %s376_s12, %s377_s13  }
  0x25   : > { %p104_p11 = scmp.lt.s32.totalorder %s373_s9, 5  ;;  %p495_p13 = scmp.ge.s32.totalorder %s373_s9, 1 }
  0x27   : > { %p105_p0 = pnand %p495_p13, %p104_p11 }
  0x28   : > { %s110_s16 = sand.u32 (!%p105_p0), 1, %s365_s7   ;;  %p496_p7 = scmp.ne.s32.totalorder (!%p105_p0), %s493_s15, 0 }
  0x29   : > { %108 = sbr.rel (%p105_p0) target bundleno = 297 (0x129), region = 24  ;;  %s261_s17 = sshll.u32 (!%p105_p0), %s110_s16, 5 }
  0x2a   : > { %s111_s18 = scalar_lea.sflag (!%p105_p0), [#allocation3], %s110_s16  ;;  %s114_s19 = scalar_lea.vmem (!%p105_p0), [#allocation2], %s261_s17 }
  0x2e   : > { %356 = dma.done.wait (%p496_p7), %s111_s18, 512  }
  0x2f   : > { %358 = vsyncadd (%p496_p7), %s111_s18, 4294966784  ;;  %v140_v0 = vld [vmem:[%s114_s19] sm:$0xff]  ;;  %v144_v1 = vld [vmem:[%s114_s19 + $0x8] sm:$0xff]  ;;  %s378_s20 = smov 64   ;;  %s379_s15 = smov 32   ;;  %vm182_vm0 = vcmask 261120  }
  0x30   : > { %v141_v2 = vld [vmem:[%s114_s19 + $0x10] sm:$0xff]  ;;  %v146_v3 = vadd.f32 %v144_v1, %v140_v0  ;;  %v145_v4 = vld [vmem:[%s114_s19 + $0x18] sm:$0xff]  ;;  %v142_v5 = vmul.f32 %v140_v0, %v140_v0  ;;  %v148_v6 = vmul.f32 %v144_v1, %v144_v1  ;;  %s262_s21 = sshll.u32 %s252_s10, 1 }
  0x31   : > { %v143_v7 = vmul.f32 %v141_v2, %v141_v2  ;;  %v149_v8 = vmul.f32 %v145_v4, %v145_v4  ;;  %v147_v9 = vadd.f32 %v145_v4, %v141_v2  ;;  %p135_p8 = scmp.lt.s32.totalorder %s262_s21, 7 }
  0x32   : > { %152 = vrot.lane.b32.xlu0 %v146_v3, %s378_s20  ;;  %v150_v10 = vadd.f32 %v148_v6, %v142_v5 }
  0x33   : > { %v151_v11 = vadd.f32 %v149_v8, %v143_v7  ;;  %s502_s21 = smov (!%p135_p8, %s262_s21), 7 }
  0x34   : > { %158 = vrot.lane.b32.xlu1 %v150_v10, %s378_s20  ;;  %s263_s22 = sshll.u32 %s502_s21, 3 }
  0x35   : > { %s138_s25 = scalar_lea.vmem %s491_s1, %s263_s22 }
  0x36   : > { %154 = vrot.lane.b32.xlu0 %v147_v9, %s378_s20 }
  0x38   : > { %160 = vrot.lane.b32.xlu1 %v151_v11, %s378_s20 }
  0xa4   : > { %v153_v12 = vpop.permute.xlu0 %152 }
  0xa5   : > { %v156_v13 = vadd.f32 %v153_v12, %v146_v3 }
  0xa6   : > { %v159_v14 = vpop.permute.xlu1 %158 }
  0xa7   : > { %164 = vrot.lane.b32.xlu0 %v156_v13, %s379_s15  ;;  %v162_v15 = vadd.f32 %v159_v14, %v150_v10 }
  0xa8   : > { %v155_v16 = vpop.permute.xlu0 %154 }
  0xa9   : > { %v157_v17 = vadd.f32 %v155_v16, %v147_v9 }
  0xaa   : > { %v161_v18 = vpop.permute.xlu1 %160 }
  0xab   : > { %166 = vrot.lane.b32.xlu1 %v157_v17, %s379_s15  ;;  %170 = vrot.lane.b32.xlu0 %v162_v15, %s379_s15  ;;  %v163_v19 = vadd.f32 %v161_v18, %v151_v11 }
  0xaf   : > { %172 = vrot.lane.b32.xlu1 %v163_v19, %s379_s15 }
 0x119   : > { %v165_v20 = vpop.permute.xlu0 %164 }
 0x11a   : > { %v168_v21 = vadd.f32 %v165_v20, %v156_v13 }
 0x11c   : > { %v176_v24 = vmul.f32 %v168_v21, %v168_v21 }
 0x11d   : > { %v171_v22 = vpop.permute.xlu0 %170  ;;  %v167_v23 = vpop.permute.xlu1 %166 }
 0x11e   : > { %v174_v25 = vadd.f32 %v171_v22, %v162_v15  ;;  %v169_v26 = vadd.f32 %v167_v23, %v157_v17 }
 0x120   : > { %v178_v27 = vsub.f32 %v176_v24, %v174_v25  ;;  %v177_v30 = vmul.f32 %v169_v26, %v169_v26 }
 0x121   : > { %v173_v28 = vpop.permute.xlu1 %172 }
 0x122   : > { %v180_v29 = vmul.f32 0.5, %v178_v27  ;;  %v175_v31 = vadd.f32 %v173_v28, %v163_v19 }
 0x124   : > { %183 = vst.msk [vmem:[%s138_s25] sm:$0xff] %vm182_vm0, %v180_v29  ;;  %v179_v32 = vsub.f32 %v177_v30, %v175_v31 }
 0x126   : > { %v181_v33 = vmul.f32 0.5, %v179_v32 }
 0x128   : > { %184 = vst.msk [vmem:[%s138_s25 + $0x8] sm:$0xff] %vm182_vm0, %v181_v33 }
 0x129 PF: > { %p11_p9 = scmp.ge.s32.totalorder %s410_s11, 6   ;;  %s497_s6 = smov %s365_s7 }
 0x12a   : > { %s498_s7 = smov %s369_s8  ;;  %s499_s8 = smov %s420_s14 }
 0x12b   : > { %s500_s9 = smov %s410_s11  ;;  %13 = sbr.rel (!%p11_p9) target bundleno = 3 (0x3), region = 64 }
 0x130   :  { %207 = vsyncpa [#allocation3], 1 }
 0x131   :  { %209 = vsyncpa [#allocation3 + $0x1], 1 }

</bundles_post_ra>
